<compile_context>
chip_gen: v7x
topology: tpu7x:2x2x1
jax: 0.10.0
libtpu: 0.0.40
codegen_flags: <defaults>
</compile_context>

<pallas_src>
import jax
import jax.numpy as jnp
from jax.experimental import pallas as pl
from jax.experimental.pallas import tpu as pltpu

BN_EPS = 1e-5


def residual_kernel(x_ref, w_ref, p_ref, o_ref):
    n = x_ref.shape[0]
    c_out = o_ref.shape[1]

    # MXU-native bf16 operands, f32 accumulation. Single fused matmul for both paths:
    # columns [0, c_out) are the main-path linear, [c_out, 2*c_out) the residual projection.
    x = x_ref[...].astype(jnp.bfloat16)                       # (N, C_in)
    w = w_ref[...]                                            # (C_in, 2*C_out) bf16
    yz = jnp.dot(x, w, preferred_element_type=jnp.float32)    # (N, 2*C_out) f32

    y = yz[:, :c_out]                                         # main path (pre-BN; bias dropped)
    r = yz[:, c_out:]                                         # residual projection (pre-bias)

    gamma = p_ref[0:1, :]                                     # (1, C_out)
    beta = p_ref[1:2, :]
    b_res = p_ref[2:3, :]

    # BatchNorm1d training-mode batch stats in one pass (biased variance).
    inv_n = 1.0 / n
    mean = jnp.sum(y, axis=0, keepdims=True) * inv_n
    var = jnp.sum(y * y, axis=0, keepdims=True) * inv_n - mean * mean

    # Fold BN into a single per-feature scale/shift (rsqrt goes to the EUP slot).
    s = gamma * jax.lax.rsqrt(var + BN_EPS)
    t = beta - mean * s

    y = jnp.maximum(y * s + t, 0.0)                           # BN + ReLU (post_act)
    o_ref[...] = (y + r + b_res).astype(o_ref.dtype)


def pack_params(w1, gamma, beta, w_res, b_res):
    """One-time parameter prep (call at init, NOT per forward). b1 is intentionally omitted:
    it cancels exactly under training-mode BatchNorm."""
    w_fused = jnp.concatenate(
        [jnp.asarray(w1, jnp.float32).T, jnp.asarray(w_res, jnp.float32).T], axis=1
    ).astype(jnp.bfloat16)                                    # (C_in, 2*C_out)
    params = jnp.stack(
        [jnp.asarray(gamma, jnp.float32),
         jnp.asarray(beta, jnp.float32),
         jnp.asarray(b_res, jnp.float32)], axis=0)            # (3, C_out)
    return w_fused, params


def residual_forward(x, w_fused, params):
    """x: (N, C_in) f32; w_fused: (C_in, 2*C_out) bf16; params: (3, C_out) f32."""
    n = x.shape[0]
    c_out = params.shape[1]
    vmem = pl.BlockSpec(memory_space=pltpu.MemorySpace.VMEM)
    return pl.pallas_call(
        residual_kernel,
        out_shape=jax.ShapeDtypeStruct((n, c_out), jnp.float32),
        in_specs=[vmem, vmem, vmem],
        out_specs=vmem,
    )(jnp.asarray(x, jnp.float32), w_fused, params)


def residual_reference_f32(x, w1, b1, gamma, beta, w_res, b_res):
    """PyTorch-faithful f32 reference (includes b1; two-pass biased variance)."""
    y = x @ w1.T + b1
    mean = jnp.mean(y, axis=0, keepdims=True)
    var = jnp.mean((y - mean) ** 2, axis=0, keepdims=True)
    y = (y - mean) / jnp.sqrt(var + BN_EPS) * gamma + beta
    y = jnp.maximum(y, 0.0)
    return y + (x @ w_res.T + b_res)


def residual_reference_bf16(x, w1, gamma, beta, w_res, b_res):
    """Reference mirroring kernel numerics (bf16 matmul inputs, f32 accumulate, folded BN)."""
    xb = x.astype(jnp.bfloat16)
    y = jnp.dot(xb, w1.astype(jnp.bfloat16).T, preferred_element_type=jnp.float32)
    r = jnp.dot(xb, w_res.astype(jnp.bfloat16).T, preferred_element_type=jnp.float32)
    inv_n = 1.0 / x.shape[0]
    mean = jnp.sum(y, axis=0, keepdims=True) * inv_n
    var = jnp.sum(y * y, axis=0, keepdims=True) * inv_n - mean * mean
    s = gamma * jax.lax.rsqrt(var + BN_EPS)
    t = beta - mean * s
    return jnp.maximum(y * s + t, 0.0) + r + b_res


if __name__ == "__main__":
    N, C_IN, C_OUT = 8, 32, 64

    key = jax.random.PRNGKey(0)
    kx, k1, k2, k3, k4 = jax.random.split(key, 5)

    x = jax.random.normal(kx, (N, C_IN), jnp.float32)

    lim1 = 1.0 / jnp.sqrt(C_IN)
    w1 = jax.random.uniform(k1, (C_OUT, C_IN), jnp.float32, -lim1, lim1)
    b1 = jax.random.uniform(k2, (C_OUT,), jnp.float32, -lim1, lim1)   # provably a no-op under BN
    gamma = jnp.ones((C_OUT,), jnp.float32)
    beta = jnp.zeros((C_OUT,), jnp.float32)
    w_res = jax.random.uniform(k3, (C_OUT, C_IN), jnp.float32, -lim1, lim1)
    b_res = jax.random.uniform(k4, (C_OUT,), jnp.float32, -lim1, lim1)

    # One-time prep (init-time), then the hot-path forward with only 3 operands.
    w_fused, params = pack_params(w1, gamma, beta, w_res, b_res)
    out = residual_forward(x, w_fused, params)
    out = jax.block_until_ready(out)
    assert out.shape == (N, C_OUT)

    # (1) Tight check vs. a reference that mirrors the kernel numerics.
    ref_bf16 = residual_reference_bf16(x, w1, gamma, beta, w_res, b_res)
    assert jnp.allclose(out, ref_bf16, atol=1e-3, rtol=1e-3), "mismatch vs bf16-matched reference"

    # (2) Semantic check vs. the PyTorch-faithful f32 reference (b1 included there; tolerance
    #     accounts only for bf16 MXU inputs).
    ref_f32 = residual_reference_f32(x, w1, b1, gamma, beta, w_res, b_res)
    assert jnp.allclose(out, ref_f32, atol=5e-2, rtol=5e-2), "mismatch vs f32 PyTorch reference"

    print("KERNEL_OK")
</pallas_src>

<mosaic_0001>
module attributes {stable_mosaic.version = 11 : i64} {
  func.func @residual_kernel(%arg0: memref<8x32xf32, #tpu.memory_space<vmem>>, %arg1: memref<32x128xbf16, #tpu.memory_space<vmem>>, %arg2: memref<3x64xf32, #tpu.memory_space<vmem>>, %arg3: memref<8x64xf32, #tpu.memory_space<vmem>>) attributes {dimension_semantics = [], scalar_prefetch = 0 : i64, scratch_operands = 0 : i64, tpu.core_type = #tpu.core_type<tc>} {
    %c0 = arith.constant 0 : index
    %c0_0 = arith.constant 0 : index
    %0 = vector.load %arg0[%c0, %c0_0] : memref<8x32xf32, #tpu.memory_space<vmem>>, vector<8x32xf32>
    %1 = arith.truncf %0 : vector<8x32xf32> to vector<8x32xbf16>
    %c0_1 = arith.constant 0 : index
    %c0_2 = arith.constant 0 : index
    %2 = vector.load %arg1[%c0_1, %c0_2] : memref<32x128xbf16, #tpu.memory_space<vmem>>, vector<32x128xbf16>
    %cst = arith.constant dense<0.000000e+00> : vector<8x128xf32>
    %3 = tpu.matmul %1, %2, %cst {dimension_numbers = #tpu.dot_dimension_numbers<[1], [0], [0], [1], [0, 0, 1, 1], [], []>} : vector<8x32xbf16>, vector<32x128xbf16>, vector<8x128xf32> -> vector<8x128xf32>
    %4 = vector.extract_strided_slice %3 {offsets = [0, 0], sizes = [8, 64], strides = [1, 1]} : vector<8x128xf32> to vector<8x64xf32>
    %5 = vector.extract_strided_slice %3 {offsets = [0, 64], sizes = [8, 64], strides = [1, 1]} : vector<8x128xf32> to vector<8x64xf32>
    %c0_3 = arith.constant 0 : index
    %c0_4 = arith.constant 0 : index
    %6 = vector.load %arg2[%c0_3, %c0_4] : memref<3x64xf32, #tpu.memory_space<vmem>>, vector<1x64xf32>
    %c1 = arith.constant 1 : index
    %c0_5 = arith.constant 0 : index
    %7 = vector.load %arg2[%c1, %c0_5] : memref<3x64xf32, #tpu.memory_space<vmem>>, vector<1x64xf32>
    %c2 = arith.constant 2 : index
    %c0_6 = arith.constant 0 : index
    %8 = vector.load %arg2[%c2, %c0_6] : memref<3x64xf32, #tpu.memory_space<vmem>>, vector<1x64xf32>
    %cst_7 = arith.constant dense<0.000000e+00> : vector<64xf32>
    %9 = vector.multi_reduction <add>, %4, %cst_7 [0] : vector<8x64xf32> to vector<64xf32>
    %10 = vector.shape_cast %9 : vector<64xf32> to vector<1x64xf32>
    %cst_8 = arith.constant 1.250000e-01 : f32
    %11 = vector.broadcast %cst_8 : f32 to vector<1x64xf32>
    %12 = arith.mulf %10, %11 : vector<1x64xf32>
    %13 = arith.mulf %4, %4 : vector<8x64xf32>
    %cst_9 = arith.constant dense<0.000000e+00> : vector<64xf32>
    %14 = vector.multi_reduction <add>, %13, %cst_9 [0] : vector<8x64xf32> to vector<64xf32>
    %15 = vector.shape_cast %14 : vector<64xf32> to vector<1x64xf32>
    %cst_10 = arith.constant 1.250000e-01 : f32
    %16 = vector.broadcast %cst_10 : f32 to vector<1x64xf32>
    %17 = arith.mulf %15, %16 : vector<1x64xf32>
    %18 = arith.mulf %12, %12 : vector<1x64xf32>
    %19 = arith.subf %17, %18 : vector<1x64xf32>
    %cst_11 = arith.constant 9.99999974E-6 : f32
    %20 = vector.broadcast %cst_11 : f32 to vector<1x64xf32>
    %21 = arith.addf %19, %20 : vector<1x64xf32>
    %22 = math.rsqrt %21 : vector<1x64xf32>
    %23 = arith.mulf %6, %22 : vector<1x64xf32>
    %24 = arith.mulf %12, %23 : vector<1x64xf32>
    %25 = arith.subf %7, %24 : vector<1x64xf32>
    %26 = vector.broadcast %23 : vector<1x64xf32> to vector<8x64xf32>
    %27 = arith.mulf %4, %26 : vector<8x64xf32>
    %28 = vector.broadcast %25 : vector<1x64xf32> to vector<8x64xf32>
    %29 = arith.addf %27, %28 : vector<8x64xf32>
    %cst_12 = arith.constant 0.000000e+00 : f32
    %30 = vector.broadcast %cst_12 : f32 to vector<8x64xf32>
    %31 = arith.maximumf %29, %30 : vector<8x64xf32>
    %32 = arith.addf %31, %5 : vector<8x64xf32>
    %33 = vector.broadcast %8 : vector<1x64xf32> to vector<8x64xf32>
    %34 = arith.addf %32, %33 : vector<8x64xf32>
    %c0_13 = arith.constant 0 : index
    %c0_14 = arith.constant 0 : index
    %35 = vector.load %arg3[%c0_13, %c0_14] : memref<8x64xf32, #tpu.memory_space<vmem>>, vector<8x64xf32>
    tpu.vector_store %arg3[%c0_13, %c0_14], %34 {strides = array<i32>} : memref<8x64xf32, #tpu.memory_space<vmem>>, vector<8x64xf32>,
    return
  }
}

</mosaic_0001>

<bundles_post_ra>
// kernel: tpu_custom_call.1
= control target key start
LH: loop header
LB: loop body
LE: loop exit
PB: predicated region body
PF: predicated region fallthrough
CT: control target
= control target key end

     0   :  { %8 = vsyncpa [#allocation3], 0  ;;  %s350_s0 = inlined_call_operand.hbm [shape: f32[8,32], index: 0, kind: input, shape index: {}]   ;;  %s351_s1 = inlined_call_operand.hbm [shape: bf16[32,128], index: 1, kind: input, shape index: {}]   ;;  %s352_s2 = inlined_call_operand.vmem [shape: f32[3,64], index: 2, kind: input, shape index: {}]   ;;  %s353_s3 = inlined_call_operand.hbm [shape: f32[8,64], index: 3, kind: output, shape index: {}]  }
   0x1   :  { %9 = vsyncpa [#allocation6], 0 }
   0x2   :  { %10 = vsyncpa [#allocation4], 0  ;;  %s268_s12 = smov [#allocation2]   ;;  %s269_s14 = smov [#allocation5]  }
   0x3   :  { %s17_s13 = sshll.u32 %s268_s12, 4  ;;  %s26_s15 = sshll.u32 %s269_s14, 4  ;;  %s18_s13 = int_to_ptr.vmem [resolvable:$true] %s17_s13  ;;  %s295_s15 = int_to_ptr.vmem [resolvable:$true] %s26_s15 }
   0x4   :  { %s196_s18 = scalar_lea.hbm %s350_s0, 128 }
   0x5   :  { %p197_p0 = scmp.ne.s32.totalorder %s350_s0, %s196_s18  ;;  %p200_p1 = scmp.lt.u32.totalorder %s196_s18, %s350_s0 }
   0x7   :  { %p202_p2 = pnand %p200_p1, %p197_p0 }
   0x9   :  { %205 = shalt.err (!%p202_p2)
}
   0xa   :  { %s206_s23 = scalar_lea.vmem %s18_s13, 128  ;;  %p211_p4 = scmp.lt.s32.totalorder %s18_s13, %s18_s13 }
   0xb   :  { %p207_p3 = scmp.ne.s32.totalorder %s18_s13, %s206_s23  ;;  %p212_p5 = scmp.lt.s32.totalorder %s206_s23, %s206_s23 }
   0xd   :  { %p213_p6 = por %p212_p5, %p211_p4 }
   0xf   :  { %p214_p7 = pnand %p213_p6, %p207_p3 }
  0x11   :  { %217 = shalt.err (!%p214_p7)
}
  0x12   :  { %20 = dma.hbm_to_vmem [thread:$0]  %s350_s0, 128, %s18_s13, [#allocation3]  }
  0x13   :  { %s218_s28 = scalar_lea.hbm %s351_s1, 256 }
  0x14   :  { %p219_p8 = scmp.ne.s32.totalorder %s351_s1, %s218_s28  ;;  %p222_p9 = scmp.lt.u32.totalorder %s218_s28, %s351_s1 }
  0x16   :  { %p224_p10 = pnand %p222_p9, %p219_p8 }
  0x18   :  { %227 = shalt.err (!%p224_p10)
}
  0x19   :  { %s228_s6 = scalar_lea.vmem %s295_s15, 256  ;;  %p233_p12 = scmp.lt.s32.totalorder %s295_s15, %s295_s15 }
  0x1a   :  { %p229_p11 = scmp.ne.s32.totalorder %s295_s15, %s228_s6  ;;  %p234_p13 = scmp.lt.s32.totalorder %s228_s6, %s228_s6 }
  0x1c   :  { %p235_p0 = por %p234_p13, %p233_p12 }
  0x1e   :  { %p236_p1 = pnand %p235_p0, %p229_p11 }
  0x20   :  { %239 = shalt.err (!%p236_p1)
}
  0x21   :  { %s270_s0 = smov 64   ;;  %s271_s7 = smov 4  }
  0x22   :  { %32 = dma.hbm_to_vmem [thread:$0]  %s351_s1, 256, %s295_s15, [#allocation6], %s270_s0, %s270_s0, %s271_s7  }
  0x23   :  { %262 = dma.done.wait [#allocation3], 128  }
  0x24   :  { %263 = vsyncadd [#allocation3], 4294967168 }
  0x25   :  { %264 = dma.done.wait [#allocation6], 256  }
  0x26   :  { %265 = vsyncadd [#allocation6], 4294967040  ;;  %v272_v0 = vmov 0.0   ;;  %vm273_vm0 = vmmov 0   ;;  %v192_v1 = vld [vmem:[#allocation5] sm:$0xff]   ;;  %v193_v2 = vld [vmem:[#allocation5 + $0x8] sm:$0xff]   ;;  %v132_v31 = vlaneseq }
  0x27   :  { %177 = vmatprep.subr.bf16.mxu0 %v272_v0  ;;  %181 = vmatprep.mubr.msk.bf16.mxu0 %vm273_vm0, %v272_v0  ;;  %v42_v3 = vld [vmem:[#allocation2] sm:$0xff]  ;;  %vm60_vm1 = vcmask 261120   ;;  %vm107_vm2 = vcmask 523264   ;;  %s274_s15 = smov [#allocation7]  }
  0x28   :  { %178 = vmatpush3.bf16.msra.mxu0 %v192_v1  ;;  %v43_v4 = vpack.c.bf16 %v42_v3, %v42_v3  ;;  %v104_v30 = vld [vmem:[%s352_s2] sm:$0x1]  ;;  %v133_v33 = vshrl.u32 %v132_v31, 7  ;;  %v105_v35 = vld [vmem:[%s352_s2 + $0x1] sm:$0x1]  ;;  %s160_s16 = sshll.u32 %s274_s15, 4  ;;  %s161_s16 = int_to_ptr.vmem [resolvable:$true] %s160_s16 }
  0x29   :  { %179 = vmatprep.subr.bf16.mxu0 %v272_v0  ;;  %v173_v43 = vld [vmem:[%s352_s2 + $0x2] ss:$0 sm:$0xff]  ;;  %s240_s17 = scalar_lea.vmem %s161_s16, 128  ;;  %p245_p3 = scmp.lt.s32.totalorder %s161_s16, %s161_s16 }
  0x2a   :  { %v134_v36 = vsub.s32 0, %v133_v33  ;;  %p241_p2 = scmp.ne.s32.totalorder %s161_s16, %s240_s17  ;;  %p246_p4 = scmp.lt.s32.totalorder %s240_s17, %s240_s17 }
  0x2c   :  { %180 = vmatpush3.bf16.msra.mxu0 %v193_v2  ;;  %p247_p5 = por %p246_p4, %p245_p3 }
  0x2e   :  { %p248_p6 = pnand %p247_p5, %p241_p2 }
  0x2f   :  { %182 = vmatmul.mubr.msk.bf16.vlgmr.msra.gmra.mrb[0].mxu0 %vm60_vm1, %v43_v4 }
 0x102   :  { %v98_v5 = vpop.f32.mrb[0].mxu0 }
 0x103   :  { %v183_v6 = vpop.f32.mrb[1].mxu0  ;;  %144 = vrot.lane.b32.xlu0 %v98_v5, %s270_s0  ;;  %v116_v9 = vmul.f32 %v98_v5, %v98_v5  ;;  %v108_v10 = vsel %vm107_vm2, %v98_v5, 0.0 }
 0x104   :  { %v101_v7 = vpop.f32.mrb[2].mxu0  ;;  %v109_v11 = vrot.slane %v108_v10, 4 }
 0x105   :  { %v184_v8 = vpop.f32.mrb[3].mxu0  ;;  %v117_v12 = vsel %vm107_vm2, %v116_v9, 0.0 }
 0x106   :  { %v110_v13 = vadd.f32 %v109_v11, %v108_v10  ;;  %v118_v14 = vrot.slane %v117_v12, 4 }
 0x108   :  { %v111_v15 = vrot.slane %v110_v13, 2  ;;  %v119_v16 = vadd.f32 %v118_v14, %v117_v12 }
 0x10a   :  { %v112_v17 = vadd.f32 %v111_v15, %v110_v13  ;;  %v120_v18 = vrot.slane %v119_v16, 2 }
 0x10c   :  { %v113_v19 = vrot.slane %v112_v17, 1  ;;  %v121_v20 = vadd.f32 %v120_v18, %v119_v16 }
 0x10e   :  { %v114_v21 = vadd.f32 %v113_v19, %v112_v17  ;;  %v122_v22 = vrot.slane %v121_v20, 1 }
 0x110   :  { %v115_v23 = vmul.f32 0.125, %v114_v21  ;;  %v123_v24 = vadd.f32 %v122_v22, %v121_v20 }
 0x112   :  { %v124_v25 = vmul.f32 0.125, %v123_v24  ;;  %v125_v26 = vmul.f32 %v115_v23, %v115_v23 }
 0x114   :  { %v126_v27 = vsub.f32 %v124_v25, %v125_v26 }
 0x116   :  { %v127_v28 = vadd.f32 1e-05, %v126_v27 }
 0x118   :  { %194 = vrsqrt.f32 %v127_v28 }
 0x122   :  { %v195_v29 = vpop.eup %194 }
 0x123   :  { %v129_v32 = vmul.f32 %v195_v29, %v104_v30 }
 0x125   :  { %v130_v34 = vmul.f32 %v129_v32, %v115_v23  ;;  %v135_v38 = vrot.slane %v129_v32, %v134_v36 }
 0x127   :  { %v131_v37 = vsub.f32 %v105_v35, %v130_v34  ;;  %v136_v40 = vmul.f32 %v135_v38, %v98_v5 }
 0x129   :  { %v140_v39 = vrot.slane %v131_v37, %v134_v36 }
 0x12b   :  { %v141_v41 = vadd.f32 %v140_v39, %v136_v40 }
 0x12d   :  { %v142_v42 = vmax.f32 %v141_v41, 0.0 }
 0x175   :  { %v145_v44 = vpop.permute.xlu0 %144 }
 0x176   :  { %v147_v45 = vadd.f32 %v145_v44, %v142_v42 }
 0x178   :  { %v152_v46 = vadd.f32 %v173_v43, %v147_v45 }
 0x17a   :  { %153 = vst.msk [vmem:[#allocation7] sm:$0xff] %vm107_vm2, %v152_v46 }
 0x17b   :  { %251 = shalt.err (!%p248_p6)
}
 0x17c   :  { %s252_s20 = scalar_lea.hbm %s353_s3, 128 }
 0x17d   :  { %p253_p7 = scmp.ne.s32.totalorder %s353_s3, %s252_s20  ;;  %p256_p8 = scmp.lt.u32.totalorder %s252_s20, %s353_s3 }
 0x17f   :  { %p258_p9 = pnand %p256_p8, %p253_p7 }
 0x181   :  { %261 = shalt.err (!%p258_p9)
}
 0x182   :  { %163 = dma.vmem_to_hbm [thread:$0]  %s161_s16, 128, %s353_s3, [#allocation4]  }
 0x183   :  { %266 = dma.done.wait [#allocation4], 128  }
 0x184   :  { %267 = vsyncadd [#allocation4], 4294967168 }
 0x185   :  { %167 = vsyncpa [#allocation3], 1 }
 0x186   :  { %168 = vsyncpa [#allocation6], 1 }
 0x187   :  { %169 = vsyncpa [#allocation4], 1 }

</bundles_post_ra>
